<compile_context>
chip_gen: v7x
topology: tpu7x:2x2x1
jax: 0.10.0
libtpu: 0.0.40
codegen_flags: <defaults>
</compile_context>

<pallas_src>
import functools

import jax
import jax.numpy as jnp
from jax.experimental import pallas as pl
from jax.experimental.pallas import tpu as pltpu

C1 = 128
C2 = 64
C3 = 1


def _fused_1x1_mlp_kernel(x_ref, w1_ref, b1_ref, w2_ref, b2_ref, w3_ref,
                          b3_ref, o_ref):
    """Fused relu(W1@x+b1) -> relu(W2@.+b2) -> sum(w3*.)+b3 on one pixel tile.

    x_ref : (C_in, tn)  activations (f32 or bf16; cast to bf16 for the MXU)
    w1_ref: (C1, C_in)  bf16      b1_ref: (C1, 1) f32
    w2_ref: (C2, C1)    bf16      b2_ref: (C2, 1) f32
    w3_ref: (C2, 1)     f32       b3_ref: (1, 1)  f32
    o_ref : (1, tn)     f32
    """
    # bf16 operands -> fast MXU mode; accumulation stays f32.
    x = x_ref[...].astype(jnp.bfloat16)

    h1 = jnp.dot(w1_ref[...], x, preferred_element_type=jnp.float32)
    h1 = jnp.maximum(h1 + b1_ref[...], 0.0)                      # f32 (C1, tn)

    h2 = jnp.dot(w2_ref[...], h1.astype(jnp.bfloat16),
                 preferred_element_type=jnp.float32)
    h2 = jnp.maximum(h2 + b2_ref[...], 0.0)                      # f32 (C2, tn)

    # Layer 3: single output row -> VPU multiply + sublane (XLU) reduction
    # instead of an M=1 MXU matmul.  No ReLU on the last layer.
    y = jnp.sum(w3_ref[...] * h2, axis=0, keepdims=True) + b3_ref[...]

    o_ref[...] = y.astype(o_ref.dtype)                           # (1, tn)


def _pick_pixel_tile(P, B, max_tile=2048, min_steps=4):
    """Largest lane-friendly pixel tile that avoids an HBM pad copy, while
    leaving enough grid steps for megacore sharding + DMA overlap."""
    if P % 128 == 0:
        t = min(max_tile, P)
        while P % t != 0:                 # largest multiple of 128 dividing P
            t -= 128
        # Shrink (keeping lane-dense, divisor-of-P tiles) until there are at
        # least `min_steps` grid steps, so both v7x TensorCores get work and
        # the input pipeline has iterations to overlap.
        while t > 128 and B * (P // t) < min_steps:
            nt = t - 128
            while nt > 128 and P % nt != 0:
                nt -= 128
            if P % nt != 0:
                break
            t = nt
        return t
    if P <= max_tile:
        return P          # full-extent last dim: allowed, no padding
    return max_tile       # rare ragged & large case: wrapper pads


@functools.partial(jax.jit, static_argnames=("tn",))
def _fused_1x1_mlp(x3d, w1, b1, w2, b2, w3, b3, *, tn):
    """x3d: (B, C_in, P) f32/bf16  ->  (B, 1, P) float32."""
    B, c_in, P = x3d.shape
    c1, c2, c3 = w1.shape[0], w2.shape[0], w3.shape[0]

    # MXU operand weights in bf16 (tiny one-off casts); biases stay f32.
    w1 = w1.astype(jnp.bfloat16)
    w2 = w2.astype(jnp.bfloat16)
    b1 = b1.astype(jnp.float32)
    b2 = b2.astype(jnp.float32)
    # Layer-3 weight as an f32 column vector for the VPU/XLU reduction path.
    w3_col = w3.T.astype(jnp.float32)            # (c2, 1); c3 == 1
    b3 = b3.astype(jnp.float32)

    pad = (-P) % tn
    if pad:
        # Only hit when P is not a multiple of 128 AND larger than max tile.
        x3d = jnp.pad(x3d, ((0, 0), (0, 0), (0, pad)))
    Pp = P + pad
    grid = (B, Pp // tn)

    x_bytes = x3d.dtype.itemsize
    cost = pl.CostEstimate(
        flops=2 * B * Pp * (c_in * c1 + c1 * c2 + c2 * c3),
        transcendentals=0,
        bytes_accessed=(x_bytes * B * Pp * c_in            # x read
                        + 4 * B * Pp * c3                  # y write (f32)
                        + 2 * (c1 * c_in + c2 * c1)        # bf16 weights
                        + 4 * (c2 * c3 + c1 + c2 + c3)),   # f32 w3 + biases
    )

    out = pl.pallas_call(
        _fused_1x1_mlp_kernel,
        out_shape=jax.ShapeDtypeStruct((B, c3, Pp), jnp.float32),
        grid_spec=pltpu.PrefetchScalarGridSpec(
            num_scalar_prefetch=0,
            grid=grid,
            in_specs=[
                # activations: one batch row, all channels, a tile of pixels
                pl.BlockSpec((None, c_in, tn), lambda b, j: (b, 0, j)),
                # weights / biases: whole arrays, resident every step
                pl.BlockSpec((c1, c_in), lambda b, j: (0, 0)),
                pl.BlockSpec((c1, 1), lambda b, j: (0, 0)),
                pl.BlockSpec((c2, c1), lambda b, j: (0, 0)),
                pl.BlockSpec((c2, 1), lambda b, j: (0, 0)),
                pl.BlockSpec((c2, c3), lambda b, j: (0, 0)),
                pl.BlockSpec((c3, 1), lambda b, j: (0, 0)),
            ],
            out_specs=pl.BlockSpec((None, c3, tn), lambda b, j: (b, 0, j)),
        ),
        compiler_params=pltpu.CompilerParams(
            dimension_semantics=("parallel", "parallel")),
        cost_estimate=cost,
    )(x3d, w1, b1, w2, b2, w3_col, b3)

    if pad:
        out = out[:, :, :P]
    return out


def init_params(key, input_channels=256, dtype=jnp.float32):
    """Deterministic synthetic parameters.

    Weights are stored as (C_out, C_in), i.e. exactly the PyTorch Conv2d
    weight (C_out, C_in, 1, 1) with the trailing 1x1 squeezed; real
    checkpoints map as  w = torch_w[:, :, 0, 0],  b = torch_b[:, None].
    """
    ks = jax.random.split(key, 6)

    def _w(k, c_out, c_in):
        scale = 1.0 / jnp.sqrt(jnp.asarray(c_in, dtype))
        return jax.random.uniform(k, (c_out, c_in), dtype,
                                  minval=-1.0, maxval=1.0) * scale

    def _b(k, c_out, c_in):
        scale = 1.0 / jnp.sqrt(jnp.asarray(c_in, dtype))
        return jax.random.uniform(k, (c_out, 1), dtype,
                                  minval=-1.0, maxval=1.0) * scale

    return dict(
        w1=_w(ks[0], C1, input_channels), b1=_b(ks[1], C1, input_channels),
        w2=_w(ks[2], C2, C1), b2=_b(ks[3], C2, C1),
        w3=_w(ks[4], C3, C2), b3=_b(ks[5], C3, C2),
    )


def cnn_feature_reduce_sat_3layers(x, params):
    """Forward pass matching the PyTorch module.

    x: (B, C_in, H, W) f32 (or bf16)  ->  (B, 1, H, W) float32.
    """
    B, c_in, H, W = x.shape
    P = H * W
    # Contiguous NCHW -> (B, C, H*W): a free reshape, NO transpose.
    x3d = x.reshape(B, c_in, P)

    tn = _pick_pixel_tile(P, B)
    out3d = _fused_1x1_mlp(x3d, params["w1"], params["b1"],
                           params["w2"], params["b2"],
                           params["w3"], params["b3"], tn=tn)
    return out3d.reshape(B, C3, H, W)


def _reference(x, params, matmul_dtype=jnp.float32):
    """Pure-JAX reference.  With matmul_dtype=bf16 it mirrors the kernel's
    bf16-operand / f32-accumulate math; with f32 it is the exact module."""
    B, c_in, H, W = x.shape
    x2 = x.reshape(B, c_in, H * W).astype(matmul_dtype)
    w1 = params["w1"].astype(matmul_dtype)
    w2 = params["w2"].astype(matmul_dtype)
    h = jnp.einsum("oc,bcp->bop", w1, x2, preferred_element_type=jnp.float32)
    h = jnp.maximum(h + params["b1"][None].astype(jnp.float32), 0.0)
    h = jnp.einsum("oc,bcp->bop", w2, h.astype(matmul_dtype),
                   preferred_element_type=jnp.float32)
    h = jnp.maximum(h + params["b2"][None].astype(jnp.float32), 0.0)
    y = jnp.einsum("oc,bcp->bop", params["w3"].astype(jnp.float32), h,
                   preferred_element_type=jnp.float32)
    y = y + params["b3"][None].astype(jnp.float32)
    return y.reshape(B, C3, H, W)


if __name__ == "__main__":
    key = jax.random.PRNGKey(0)
    k_x, k_p = jax.random.split(key)

    B, C_in, H, W = 2, 256, 16, 16     # module default input_channels=256
    x = jax.random.normal(k_x, (B, C_in, H, W), dtype=jnp.float32)
    params = init_params(k_p, input_channels=C_in)

    out = cnn_feature_reduce_sat_3layers(x, params)
    out = jax.block_until_ready(out)
    assert out.shape == (B, 1, H, W), out.shape

    # Kernel mechanics: compare against a reference using the same bf16 MXU
    # operands + f32 accumulation (tight tolerance).
    ref_bf16 = _reference(x, params, matmul_dtype=jnp.bfloat16)
    assert jnp.allclose(out, ref_bf16, atol=2e-3, rtol=2e-3), \
        "mismatch vs bf16-operand reference"

    # Module semantics: bounded drift vs. the full-f32 PyTorch-equivalent math
    # (bf16 input rounding only; accumulation/bias/ReLU stay f32).
    ref_f32 = _reference(x, params, matmul_dtype=jnp.float32)
    assert jnp.allclose(out, ref_f32, atol=3e-2, rtol=3e-2), \
        "drift vs f32 reference too large"

    print("KERNEL_OK")
</pallas_src>

<mosaic_0001>
module attributes {stable_mosaic.version = 11 : i64} {
  func.func @_fused_1x1_mlp_kernel(%arg0: i32, %arg1: i32, %arg2: memref<1x256x128xf32, #tpu.memory_space<vmem>>, %arg3: memref<128x256xbf16, #tpu.memory_space<vmem>>, %arg4: memref<128x1xf32, #tpu.memory_space<vmem>>, %arg5: memref<64x128xbf16, #tpu.memory_space<vmem>>, %arg6: memref<64x1xf32, #tpu.memory_space<vmem>>, %arg7: memref<64x1xf32, #tpu.memory_space<vmem>>, %arg8: memref<1x1xf32, #tpu.memory_space<vmem>>, %arg9: memref<1x1x128xf32, #tpu.memory_space<vmem>>) attributes {dimension_semantics = [#tpu.dimension_semantics<parallel>, #tpu.dimension_semantics<parallel>], iteration_bounds = array<i64: 2, 2>, scalar_prefetch = 0 : i64, scratch_operands = 0 : i64, tpu.core_type = #tpu.core_type<tc>, window_params = [{transform_indices = @transform_0, window_bounds = array<i64: 1, 256, 128>}, {pipeline_mode = #tpu.pipeline_mode<synchronous>, transform_indices = @transform_1, window_bounds = array<i64: 128, 256>}, {pipeline_mode = #tpu.pipeline_mode<synchronous>, transform_indices = @transform_2, window_bounds = array<i64: 128, 1>}, {pipeline_mode = #tpu.pipeline_mode<synchronous>, transform_indices = @transform_3, window_bounds = array<i64: 64, 128>}, {pipeline_mode = #tpu.pipeline_mode<synchronous>, transform_indices = @transform_4, window_bounds = array<i64: 64, 1>}, {pipeline_mode = #tpu.pipeline_mode<synchronous>, transform_indices = @transform_5, window_bounds = array<i64: 64, 1>}, {pipeline_mode = #tpu.pipeline_mode<synchronous>, transform_indices = @transform_6, window_bounds = array<i64: 1, 1>}, {transform_indices = @transform_7, window_bounds = array<i64: 1, 1, 128>}]} {
    %c0 = arith.constant 0 : index
    %c0_0 = arith.constant 0 : index
    %c0_1 = arith.constant 0 : index
    %0 = vector.load %arg2[%c0, %c0_0, %c0_1] : memref<1x256x128xf32, #tpu.memory_space<vmem>>, vector<1x256x128xf32>
    %1 = vector.shape_cast %0 : vector<1x256x128xf32> to vector<256x128xf32>
    %2 = arith.truncf %1 : vector<256x128xf32> to vector<256x128xbf16>
    %c0_2 = arith.constant 0 : index
    %c0_3 = arith.constant 0 : index
    %3 = vector.load %arg3[%c0_2, %c0_3] : memref<128x256xbf16, #tpu.memory_space<vmem>>, vector<128x256xbf16>
    %cst = arith.constant dense<0.000000e+00> : vector<128x128xf32>
    %4 = tpu.matmul %3, %2, %cst {dimension_numbers = #tpu.dot_dimension_numbers<[1], [0], [0], [1], [0, 0, 1, 1], [], []>} : vector<128x256xbf16>, vector<256x128xbf16>, vector<128x128xf32> -> vector<128x128xf32>
    %c0_4 = arith.constant 0 : index
    %c0_5 = arith.constant 0 : index
    %5 = vector.load %arg4[%c0_4, %c0_5] : memref<128x1xf32, #tpu.memory_space<vmem>>, vector<128x1xf32>
    %6 = vector.broadcast %5 : vector<128x1xf32> to vector<128x128xf32>
    %7 = arith.addf %4, %6 : vector<128x128xf32>
    %cst_6 = arith.constant 0.000000e+00 : f32
    %8 = vector.broadcast %cst_6 : f32 to vector<128x128xf32>
    %9 = arith.maximumf %7, %8 : vector<128x128xf32>
    %c0_7 = arith.constant 0 : index
    %c0_8 = arith.constant 0 : index
    %10 = vector.load %arg5[%c0_7, %c0_8] : memref<64x128xbf16, #tpu.memory_space<vmem>>, vector<64x128xbf16>
    %11 = arith.truncf %9 : vector<128x128xf32> to vector<128x128xbf16>
    %cst_9 = arith.constant dense<0.000000e+00> : vector<64x128xf32>
    %12 = tpu.matmul %10, %11, %cst_9 {dimension_numbers = #tpu.dot_dimension_numbers<[1], [0], [0], [1], [0, 0, 1, 1], [], []>} : vector<64x128xbf16>, vector<128x128xbf16>, vector<64x128xf32> -> vector<64x128xf32>
    %c0_10 = arith.constant 0 : index
    %c0_11 = arith.constant 0 : index
    %13 = vector.load %arg6[%c0_10, %c0_11] : memref<64x1xf32, #tpu.memory_space<vmem>>, vector<64x1xf32>
    %14 = vector.broadcast %13 : vector<64x1xf32> to vector<64x128xf32>
    %15 = arith.addf %12, %14 : vector<64x128xf32>
    %cst_12 = arith.constant 0.000000e+00 : f32
    %16 = vector.broadcast %cst_12 : f32 to vector<64x128xf32>
    %17 = arith.maximumf %15, %16 : vector<64x128xf32>
    %c0_13 = arith.constant 0 : index
    %c0_14 = arith.constant 0 : index
    %18 = vector.load %arg7[%c0_13, %c0_14] : memref<64x1xf32, #tpu.memory_space<vmem>>, vector<64x1xf32>
    %19 = vector.broadcast %18 : vector<64x1xf32> to vector<64x128xf32>
    %20 = arith.mulf %19, %17 : vector<64x128xf32>
    %cst_15 = arith.constant dense<0.000000e+00> : vector<128xf32>
    %21 = vector.multi_reduction <add>, %20, %cst_15 [0] : vector<64x128xf32> to vector<128xf32>
    %22 = vector.shape_cast %21 : vector<128xf32> to vector<1x128xf32>
    %c0_16 = arith.constant 0 : index
    %c0_17 = arith.constant 0 : index
    %23 = vector.load %arg8[%c0_16, %c0_17] : memref<1x1xf32, #tpu.memory_space<vmem>>, vector<1x1xf32>
    %24 = vector.broadcast %23 : vector<1x1xf32> to vector<1x128xf32>
    %25 = arith.addf %22, %24 : vector<1x128xf32>
    %c0_18 = arith.constant 0 : index
    %c0_19 = arith.constant 0 : index
    %c0_20 = arith.constant 0 : index
    %26 = vector.load %arg9[%c0_18, %c0_19, %c0_20] : memref<1x1x128xf32, #tpu.memory_space<vmem>>, vector<1x1x128xf32>
    %27 = vector.shape_cast %26 : vector<1x1x128xf32> to vector<1x128xf32>
    %28 = vector.shape_cast %25 : vector<1x128xf32> to vector<1x1x128xf32>
    tpu.vector_store %arg9[%c0_18, %c0_19, %c0_20], %28 {strides = array<i32>} : memref<1x1x128xf32, #tpu.memory_space<vmem>>, vector<1x1x128xf32>,
    return
  }
  func.func @transform_0(%arg0: i32, %arg1: i32) -> (i32, i32, i32) {
    %c0_i32 = arith.constant 0 : i32
    %c0_i32_0 = arith.constant 0 : i32
    return %arg0, %c0_i32, %arg1 : i32, i32, i32
  }
  func.func @transform_1(%arg0: i32, %arg1: i32) -> (i32, i32) {
    %c0_i32 = arith.constant 0 : i32
    %c0_i32_0 = arith.constant 0 : i32
    %c0_i32_1 = arith.constant 0 : i32
    return %c0_i32, %c0_i32_0 : i32, i32
  }
  func.func @transform_2(%arg0: i32, %arg1: i32) -> (i32, i32) {
    %c0_i32 = arith.constant 0 : i32
    %c0_i32_0 = arith.constant 0 : i32
    %c0_i32_1 = arith.constant 0 : i32
    return %c0_i32, %c0_i32_0 : i32, i32
  }
  func.func @transform_3(%arg0: i32, %arg1: i32) -> (i32, i32) {
    %c0_i32 = arith.constant 0 : i32
    %c0_i32_0 = arith.constant 0 : i32
    %c0_i32_1 = arith.constant 0 : i32
    return %c0_i32, %c0_i32_0 : i32, i32
  }
  func.func @transform_4(%arg0: i32, %arg1: i32) -> (i32, i32) {
    %c0_i32 = arith.constant 0 : i32
    %c0_i32_0 = arith.constant 0 : i32
    %c0_i32_1 = arith.constant 0 : i32
    return %c0_i32, %c0_i32_0 : i32, i32
  }
  func.func @transform_5(%arg0: i32, %arg1: i32) -> (i32, i32) {
    %c0_i32 = arith.constant 0 : i32
    %c0_i32_0 = arith.constant 0 : i32
    %c0_i32_1 = arith.constant 0 : i32
    return %c0_i32, %c0_i32_0 : i32, i32
  }
  func.func @transform_6(%arg0: i32, %arg1: i32) -> (i32, i32) {
    %c0_i32 = arith.constant 0 : i32
    %c0_i32_0 = arith.constant 0 : i32
    %c0_i32_1 = arith.constant 0 : i32
    return %c0_i32, %c0_i32_0 : i32, i32
  }
  func.func @transform_7(%arg0: i32, %arg1: i32) -> (i32, i32, i32) {
    %c0_i32 = arith.constant 0 : i32
    %c0_i32_0 = arith.constant 0 : i32
    return %arg0, %c0_i32, %arg1 : i32, i32, i32
  }
}

</mosaic_0001>

<bundles_post_ra>
// kernel: _fused_1x1_mlp.1
= control target key start
LH: loop header
LB: loop body
LE: loop exit
PB: predicated region body
PF: predicated region fallthrough
CT: control target
= control target key end

     0   :  { %s1815_s0 = inlined_call_operand.hbm [shape: f32[2,256,256], index: 0, kind: input, shape index: {}]   ;;  %s1816_s1 = inlined_call_operand.vmem [shape: bf16[128,256], index: 1, kind: input, shape index: {}]   ;;  %s1817_s2 = inlined_call_operand.vmem [shape: f32[128,1], index: 2, kind: input, shape index: {}]   ;;  %s1818_s3 = inlined_call_operand.vmem [shape: bf16[64,128], index: 3, kind: input, shape index: {}]   ;;  %s1819_s4 = inlined_call_operand.vmem [shape: f32[64,1], index: 4, kind: input, shape index: {}]   ;;  %s1820_s5 = inlined_call_operand.vmem [shape: f32[64,1], index: 5, kind: input, shape index: {}]   ;;  %s1821_s6 = inlined_call_operand.<no memory space> [shape: f32[1,1], index: 6, kind: input, shape index: {}]   ;;  %s1822_s7 = inlined_call_operand.hbm [shape: f32[2,1,256], index: 7, kind: output, shape index: {}]  }
   0x1   :  { %1828 = sst [smem:[#allocation12_spill]] %s1822_s7  ;;  %v12_v0 = vstv %s1821_s6 }
   0x2   :  { %13 = vst [vmem:[#allocation2] sm:$0x1] %v12_v0 }
   0x3   :  { %14 = vsyncpa [#allocation4], 0 }
   0x4   :  { %16 = vsyncpa [#allocation4 + $0x1], 0 }
   0x5   :  { %17 = vsyncpa [#allocation5], 0 }
   0x6   :  { %19 = vsyncpa [#allocation5 + $0x1], 0  ;;  %s1431_s26 = smov 0   ;;  %s1433_s27 = smov 0  }
   0x7   :  { %s1435_s28 = smov 0   ;;  %s1437_s29 = smov 0  }
   0x8   :  { %s1439_s30 = smov 0   ;;  %s1441_s8 = smov 0  }
   0x9   :  { %s1443_s9 = smov 0   ;;  %s1445_s6 = smov 0  }
   0xa LB: > { %1829 = sst [smem:[#allocation9_spill]] %s1352_s26  ;;  %s1007_s10 = sadd.s32 4294967295, %s1380_s6   ;;  %s1380_s6 = sphi %s1445_s6, %s25_s6   ;;  %s1376_s9 = sphi %s1443_s9, %s1850_s9   ;;  %s1372_s8 = sphi %s1441_s8, %s1849_s8   ;;  %s1368_s30 = sphi %s1439_s30, %s1848_s30   ;;  %s1364_s29 = sphi %s1437_s29, %s1847_s29   ;;  %s1360_s28 = sphi %s1435_s28, %s1846_s28   ;;  %s1356_s27 = sphi %s1433_s27, %s1845_s27   ;;  %s1352_s26 = sphi %s1431_s26, %s1844_s26  }
   0xb   : > { %s1008_s11 = sadd.s32 4294967294, %s1380_s6   ;;  %s34_s12 = sadd.s32 1, %s1372_s8 }
   0xc   : > { %s37_s13 = sadd.s32 1, %s1376_s9  ;;  %p35_p0 = scmp.ge.s32.totalorder %s34_s12, 2 }
   0xd   : > { %s46_s14 = sadd.s32 1, %s1360_s28  ;;  %p53_p1 = scmp.ne.s32.totalorder %s1360_s28, %s1356_s27 }
   0xe   : > { %p54_p2 = scmp.eq.s32.totalorder %s1380_s6, 0  ;;  %s1852_s12 = smov (%p35_p0, %s34_s12), 0 }
   0xf   : > { %1830 = sst [smem:[#allocation10_spill]] %s1852_s12  ;;  %s1854_s13 = smov (!%p35_p0, %s37_s13), %s1376_s9 }
  0x10   : > { %s42_s15 = ssub.s32 %s1372_s8, %s1852_s12  ;;  %p1484_p3 = por %p54_p2, %p53_p1 }
  0x11   : > { %p39_p4 = scmp.ge.s32.totalorder %s1854_s13, 2  ;;  %p59_p5 = scmp.ne.s32.totalorder %s1356_s27, %s1352_s26 }
  0x12   : > { %p60_p6 = scmp.eq.s32.totalorder %s1007_s10, 0  ;;  %p211_p7 = scmp.eq.s32.totalorder %s1007_s10, 3 }
  0x13   : > { %s1856_s13 = smov (%p39_p4, %s1854_s13), 0  ;;  %p217_p10 = scmp.eq.s32.totalorder %s1008_s11, 3 }
  0x14   : > { %1832 = sst [smem:[#allocation11_spill]] %s1856_s13  ;;  %p1492_p8 = por %p60_p6, %p59_p5 }
  0x15   : > { %p1496_p9 = por %p211_p7, %p53_p1  ;;  %s41_s19 = ssub.s32 %s1376_s9, %s1856_s13 }
  0x16   : > { %s43_s20 = sor.u32 %s42_s15, %s41_s19  ;;  %p1502_p12 = por %p217_p10, %p59_p5 }
  0x17   : > { %s1834_s18 = scalar_select %p1496_p9, 1, 0 }
  0x18   : > { %p44_p11 = scmp.eq.s32.totalorder %s43_s20, 0  ;;  %p1152_p13 = scmp.lt.s32.totalorder %s1380_s6, 4 }
  0x19   : > { %s1835_s21 = scalar_select %p1502_p12, 1, 0 }
  0x1a   : > { %s255_s22 = sand.u32 1, %s1360_s28   ;;  %s1012_s25 = sshll.u32 %s1376_s9, 6 }
  0x1b   : > { %s1509_s23 = scalar_select %p44_p11, %s1360_s28, %s46_s14  }
  0x1c   : > { %s1011_s24 = sshll.u32 %s255_s22, 8  ;;  %s264_s10 = sadd.s32 %s1372_s8, %s1012_s25 }
  0x1d   : > { %s259_s12 = scalar_lea.vmem [#allocation3], %s1011_s24  ;;  %s1013_s7 = sshll.u32 %s264_s10, 7 }
  0x1e   : > { %s267_s26 = sshll.u32 %s259_s12, 4  ;;  %s1518_s15 = scalar_lea.hbm %s1815_s0, %s1013_s7  ;;  %s1513_s26 = int_to_ptr.vmem [resolvable:$true] %s267_s26 }
  0x1f   : > { %p1522_p0 = pnand %p1152_p13, %p1484_p3  ;;  %s1526_s12 = scalar_lea.sflag [#allocation4], %s255_s22 }
  0x20   : > { %s1252_s19 = scalar_lea.hbm %s1518_s15, 4096  ;;  %s1257_s16 = scalar_lea.hbm %s1815_s0, 16384 }
  0x21   : > { %p1253_p1 = scmp.ne.s32.totalorder %s1518_s15, %s1252_s19  ;;  %p1254_p2 = pneg %p1522_p0 }
  0x22   : > { %p1258_p3 = scmp.lt.u32.totalorder %s1518_s15, %s1815_s0  ;;  %p1259_p6 = scmp.lt.u32.totalorder %s1257_s16, %s1252_s19 }
  0x23   : > { %p1255_p4 = pnand %p1254_p2, %p1253_p1  ;;  %p1261_p10 = scmp.lt.u32.totalorder %s1252_s19, %s1518_s15 }
  0x24   : > { %p1260_p7 = por %p1259_p6, %p1258_p3 }
  0x25   : > { %p1256_p5 = pneg %p1255_p4 }
  0x26   : > { %p1262_p11 = por %p1261_p10, %p1260_p7 }
  0x28   : > { %p1263_p13 = pnand %p1262_p11, %p1256_p5 }
  0x2a   : > { %1266 = shalt.err (!%p1263_p13)
}
  0x2b   : > { %s1267_s22 = scalar_lea.vmem %s1513_s26, 4096  ;;  %s1382_s25 = smov [#allocation3]  }
  0x2c   : > { %p1268_p1 = scmp.ne.s32.totalorder %s1513_s26, %s1267_s22  ;;  %s1272_s10 = sshll.u32 %s1382_s25, 4  ;;  %s1273_s10 = int_to_ptr.vmem [resolvable:$false] %s1272_s10 }
  0x2d   : > { %s1274_s11 = scalar_lea.vmem %s1273_s10, 8192  ;;  %p1275_p9 = scmp.lt.s32.totalorder %s1513_s26, %s1273_s10 }
  0x2e   : > { %p1270_p4 = pnand %p1268_p1, %p1254_p2  ;;  %p1276_p3 = scmp.lt.s32.totalorder %s1274_s11, %s1267_s22 }
  0x30   : > { %p1271_p12 = pneg %p1270_p4  ;;  %p1277_p6 = por %p1276_p3, %p1275_p9 }
  0x32   : > { %p1278_p7 = pnand %p1277_p6, %p1271_p12 }
  0x34   : > { %1281 = shalt.err (!%p1278_p7)
}
  0x35   : > { %s1383_s19 = smov 256   ;;  %s1384_s7 = smov 128  }
  0x36   : > { %s1385_s13 = smov 8   ;;  %p1014_p2 = scmp.ge.s32.totalorder %s1380_s6, 1 }
  0x37   : > { %1147 = dma.hbm_to_vmem [thread:$0]  (!%p1522_p0), %s1518_s15, 4096, %s1513_s26, %s1526_s12, %s1383_s19, %s1384_s7, %s1385_s13  }
  0x38   : > { %p275_p5 = scmp.lt.s32.totalorder %s1380_s6, 5 }
  0x3a   : > { %p276_p10 = pnand %p1014_p2, %p275_p5 }
  0x3b   : > { %s1557_s16 = sand.u32 (!%p276_p10), 1, %s1356_s27  }
  0x3c   : > { %279 = sbr.rel (%p276_p10) target bundleno = 649 (0x289), region = 48  ;;  %s1015_s20 = sshll.u32 (!%p276_p10), %s1557_s16, 8 }
  0x3d   : > { %s282_s24 = scalar_lea.sflag (!%p276_p10), [#allocation4], %s1557_s16  ;;  %s1561_s22 = scalar_lea.vmem (!%p276_p10), [#allocation3], %s1015_s20 }
  0x43   : > { %1343 = dma.done.wait (%p1492_p8), %s282_s24, 4096  }
  0x44   : > { %1345 = vsyncadd (%p1492_p8), %s282_s24, 4294963200  ;;  %v1386_v1 = vmov 0   ;;  %v332_v2 = vld [vmem:[%s1561_s22 + $0x80] sm:$0xff]  ;;  %v333_v3 = vld [vmem:[%s1561_s22 + $0x88] sm:$0xff]  ;;  %s1036_s10 = sshll.u32 %s1368_s30, 1  ;;  %s314_s7 = scalar_lea.vmem [#allocation6], %s1557_s16 }
  0x45   : > { %1222 = vset.pattern.permute.xlu0 %v1386_v1  ;;  %1223 = vset.pattern.permute.xlu1 %v1386_v1  ;;  %v316_v4 = vld [vmem:[%s1561_s22] sm:$0xff]  ;;  %v356_v5 = vpack.c.bf16 %v333_v3, %v332_v2  ;;  %v317_v6 = vld [vmem:[%s1561_s22 + $0x8] sm:$0xff]  ;;  %v334_v7 = vld [vmem:[%s1561_s22 + $0x90] sm:$0xff]  ;;  %s922_s11 = sadd.s32 %s1364_s29, %s1036_s10  ;;  %s926_s13 = sshll.u32 %s314_s7, 4  ;;  %s1763_s13 = int_to_ptr.vmem [resolvable:$true] %s926_s13 }
  0x46   : > { %v335_v8 = vld [vmem:[%s1561_s22 + $0x98] sm:$0xff]  ;;  %v348_v9 = vpack.c.bf16 %v317_v6, %v316_v4  ;;  %v318_v11 = vld [vmem:[%s1561_s22 + $0x10] sm:$0xff]  ;;  %v336_v13 = vld [vmem:[%s1561_s22 + $0xa0] sm:$0xff]  ;;  %s1037_s19 = sshll.u32 %s922_s11, 4  ;;  %s1837_s26 = sld [smem:[#allocation12_spill]] }
  0x47   : > { %v357_v10 = vpack.c.bf16 %v335_v8, %v334_v7  ;;  %v319_v12 = vld [vmem:[%s1561_s22 + $0x18] sm:$0xff]  ;;  %1040 = vmatprep.subr.bf16.mxu0 %v356_v5  ;;  %v337_v14 = vld [vmem:[%s1561_s22 + $0xa8] sm:$0xff]  ;;  %v320_v17 = vld [vmem:[%s1561_s22 + $0x20] sm:$0xff]  ;;  %s912_s29 = scalar_lea.sflag [#allocation5], %s1557_s16  ;;  %s1282_s30 = scalar_lea.vmem %s1763_s13, 16 }
  0x48   : > { %1041 = vmatpush3.bf16.msra.mxu0 %v348_v9  ;;  %v349_v15 = vpack.c.bf16 %v319_v12, %v318_v11  ;;  %v358_v16 = vpack.c.bf16 %v337_v14, %v336_v13  ;;  %v321_v18 = vld [vmem:[%s1561_s22 + $0x28] sm:$0xff]  ;;  %v338_v19 = vld [vmem:[%s1561_s22 + $0xb0] sm:$0xff]  ;;  %v339_v20 = vld [vmem:[%s1561_s22 + $0xb8] sm:$0xff]  ;;  %p1283_p8 = scmp.ne.s32.totalorder %s1763_s13, %s1282_s30  ;;  %p1839_p9 = scmp.ne.s32.totalorder %s1834_s18, 0 }
  0x49   : > { %1042 = vmatprep.subr.bf16.mxu0 %v357_v10  ;;  %v350_v21 = vpack.c.bf16 %v321_v18, %v320_v17  ;;  %v359_v22 = vpack.c.bf16 %v339_v20, %v338_v19  ;;  %v322_v23 = vld [vmem:[%s1561_s22 + $0x30] sm:$0xff]  ;;  %v323_v24 = vld [vmem:[%s1561_s22 + $0x38] sm:$0xff]  ;;  %v340_v25 = vld [vmem:[%s1561_s22 + $0xc0] sm:$0xff]  ;;  %s1387_s14 = smov [#allocation6]  }
  0x4a   : > { %v341_v26 = vld [vmem:[%s1561_s22 + $0xc8] sm:$0xff]  ;;  %v351_v28 = vpack.c.bf16 %v323_v24, %v322_v23  ;;  %v324_v29 = vld [vmem:[%s1561_s22 + $0x40] sm:$0xff]  ;;  %v342_v32 = vld [vmem:[%s1561_s22 + $0xd0] sm:$0xff]  ;;  %p1284_p12 = pnand %p1283_p8, %p1839_p9 }
  0x4b   : > { %v1226_v27 = vld [vmem:[%s1816_s1 + $0x4] ss:$8 sps:$4 sm:$0xff]   ;;  %v360_v30 = vpack.c.bf16 %v341_v26, %v340_v25  ;;  %v343_v33 = vld [vmem:[%s1561_s22 + $0xd8] sm:$0xff]  ;;  %v326_v35 = vld [vmem:[%s1561_s22 + $0x50] sm:$0xff] }
  0x4c   : > { %1043 = vmatpush3.bf16.msra.mxu0 %v349_v15  ;;  %v325_v31 = vld [vmem:[%s1561_s22 + $0x48] sm:$0xff]  ;;  %588 = vmatprep.mubr.bf16.mxu0 %v1226_v27  ;;  %v361_v36 = vpack.c.bf16 %v343_v33, %v342_v32  ;;  %v327_v37 = vld [vmem:[%s1561_s22 + $0x58] sm:$0xff]  ;;  %v344_v38 = vld [vmem:[%s1561_s22 + $0xe0] sm:$0xff]  ;;  %s1838_s17 = smov %s1837_s26  ;;  %s1761_s15 = scalar_lea.hbm %s1837_s26, %s1037_s19 }
  0x4d   : > { %1044 = vmatprep.subr.bf16.mxu0 %v358_v16  ;;  %v352_v34 = vpack.c.bf16 %v325_v31, %v324_v29  ;;  %v345_v39 = vld [vmem:[%s1561_s22 + $0xe8] sm:$0xff]  ;;  %v353_v40 = vpack.c.bf16 %v327_v37, %v326_v35  ;;  %v328_v41 = vld [vmem:[%s1561_s22 + $0x60] sm:$0xff]  ;;  %v346_v45 = vld [vmem:[%s1561_s22 + $0xf0] sm:$0xff]  ;;  %p1285_p0 = pneg %p1284_p12 }
  0x4e   : > { %v380_v42 = vld [vmem:[%s1817_s2] sm:$0xff]  ;;  %v362_v43 = vpack.c.bf16 %v345_v39, %v344_v38  ;;  %v329_v44 = vld [vmem:[%s1561_s22 + $0x68] sm:$0xff]  ;;  %v383_v50 = vld [vmem:[%s1817_s2 + $0x18] sm:$0xff] }
  0x4f   : > { %398 = vperm.xlu0 %1222, %v380_v42   ;;  %v347_v46 = vld [vmem:[%s1561_s22 + $0xf8] sm:$0xff]  ;;  %v381_v47 = vld [vmem:[%s1817_s2 + $0x8] sm:$0xff]  ;;  %v382_v48 = vld [vmem:[%s1817_s2 + $0x10] sm:$0xff]  ;;  %v354_v49 = vpack.c.bf16 %v329_v44, %v328_v41 }
  0x50   : > { %1045 = vmatpush3.bf16.msra.mxu0 %v350_v21  ;;  %408 = vperm.xlu1 %1223, %v382_v48   ;;  %v363_v51 = vpack.c.bf16 %v347_v46, %v346_v45  ;;  %v330_v52 = vld [vmem:[%s1561_s22 + $0x70] sm:$0xff]  ;;  %v331_v53 = vld [vmem:[%s1561_s22 + $0x78] sm:$0xff]  ;;  %v385_v56 = vld [vmem:[%s1817_s2 + $0x28] sm:$0xff]  ;;  %s1286_s22 = sshll.u32 %s1387_s14, 4  ;;  %s1287_s22 = int_to_ptr.vmem [resolvable:$false] %s1286_s22 }
  0x51   : > { %1046 = vmatprep.subr.bf16.mxu0 %v359_v22  ;;  %v384_v54 = vld [vmem:[%s1817_s2 + $0x20] sm:$0xff]  ;;  %v355_v55 = vpack.c.bf16 %v331_v53, %v330_v52  ;;  %v386_v57 = vld [vmem:[%s1817_s2 + $0x30] sm:$0xff]  ;;  %v387_v61 = vld [vmem:[%s1817_s2 + $0x38] sm:$0xff]  ;;  %s1288_s12 = scalar_lea.vmem %s1287_s22, 32  ;;  %p1289_p11 = scmp.lt.s32.totalorder %s1763_s13, %s1287_s22 }
  0x52   : > { %v1224_v58 = vld [vmem:[%s1816_s1] ss:$8 sps:$4 sm:$0xff]   ;;  %v1227_v59 = vld [vmem:[%s1816_s1 + $0x14] ss:$8 sps:$4 sm:$0xff]   ;;  %v1229_v0 = vld [vmem:[%s1816_s1 + $0x10] ss:$8 sps:$4 sm:$0xff]   ;;  %p1290_p13 = scmp.lt.s32.totalorder %s1288_s12, %s1282_s30 }
  0x53   : > { %403 = vperm.xlu0 %1222, %v381_v47   ;;  %v388_v60 = vld [vmem:[%s1817_s2 + $0x40] sm:$0xff]  ;;  %v389_v62 = vld [vmem:[%s1817_s2 + $0x48] sm:$0xff]  ;;  %v390_v63 = vld [vmem:[%s1817_s2 + $0x50] sm:$0xff] }
  0x54   : > { %1047 = vmatpush3.bf16.msra.mxu0 %v351_v28  ;;  %413 = vperm.xlu1 %1223, %v383_v50   ;;  %v1230_v1 = vld [vmem:[%s1816_s1 + $0x24] ss:$8 sps:$4 sm:$0xff]   ;;  %v391_v2 = vld [vmem:[%s1817_s2 + $0x58] sm:$0xff]  ;;  %v394_v5 = vld [vmem:[%s1817_s2 + $0x70] sm:$0xff]  ;;  %p1291_p1 = por %p1290_p13, %p1289_p11 }
  0x55   : > { %1048 = vmatprep.subr.bf16.mxu0 %v360_v30  ;;  %v392_v3 = vld [vmem:[%s1817_s2 + $0x60] sm:$0xff]  ;;  %v393_v4 = vld [vmem:[%s1817_s2 + $0x68] sm:$0xff]  ;;  %v1233_v7 = vld [vmem:[%s1816_s1 + $0x34] ss:$8 sps:$4 sm:$0xff]  }
  0x56   : > { %v1232_v6 = vld [vmem:[%s1816_s1 + $0x20] ss:$8 sps:$4 sm:$0xff]   ;;  %v395_v8 = vld [vmem:[%s1817_s2 + $0x78] sm:$0xff]  ;;  %v687_v11 = vld [vmem:[%s1819_s4 + $0x10] sm:$0xff]  ;;  %p1292_p4 = pnand %p1291_p1, %p1285_p0 }
  0x57   : > { %418 = vperm.xlu0 %1222, %v384_v54   ;;  %v685_v9 = vld [vmem:[%s1819_s4] sm:$0xff]  ;;  %v686_v10 = vld [vmem:[%s1819_s4 + $0x8] sm:$0xff]  ;;  %v1235_v12 = vld [vmem:[%s1816_s1 + $0x30] ss:$8 sps:$4 sm:$0xff]  }
  0x58   : > { %1049 = vmatpush3.bf16.msra.mxu0 %v352_v34  ;;  %423 = vperm.xlu1 %1223, %v385_v56   ;;  %v1236_v13 = vld [vmem:[%s1816_s1 + $0x44] ss:$8 sps:$4 sm:$0xff]   ;;  %v688_v14 = vld [vmem:[%s1819_s4 + $0x18] sm:$0xff]  ;;  %v1238_v18 = vld [vmem:[%s1816_s1 + $0x40] ss:$8 sps:$4 sm:$0xff]  }
  0x59   : > { %1050 = vmatprep.subr.bf16.mxu0 %v361_v36  ;;  %v830_v15 = vld [vmem:[%s1820_s5] sm:$0xff]  ;;  %v831_v16 = vld [vmem:[%s1820_s5 + $0x8] sm:$0xff]  ;;  %v1239_v19 = vld [vmem:[%s1816_s1 + $0x54] ss:$8 sps:$4 sm:$0xff]  }
  0x5a   : > { %v689_v17 = vld [vmem:[%s1819_s4 + $0x20] sm:$0xff]  ;;  %v832_v20 = vld [vmem:[%s1820_s5 + $0x10] sm:$0xff]  ;;  %v690_v21 = vld [vmem:[%s1819_s4 + $0x28] sm:$0xff] }
  0x5b   : > { %428 = vperm.xlu0 %1222, %v386_v57   ;;  %v833_v22 = vld [vmem:[%s1820_s5 + $0x18] sm:$0xff]  ;;  %v691_v23 = vld [vmem:[%s1819_s4 + $0x30] sm:$0xff]  ;;  %v1242_v25 = vld [vmem:[%s1816_s1 + $0x64] ss:$8 sps:$4 sm:$0xff]  }
  0x5c   : > { %1051 = vmatpush3.bf16.msra.mxu0 %v353_v40  ;;  %433 = vperm.xlu1 %1223, %v387_v61   ;;  %v1241_v24 = vld [vmem:[%s1816_s1 + $0x50] ss:$8 sps:$4 sm:$0xff]   ;;  %v834_v26 = vld [vmem:[%s1820_s5 + $0x20] sm:$0xff]  ;;  %v835_v28 = vld [vmem:[%s1820_s5 + $0x28] sm:$0xff] }
  0x5d   : > { %1052 = vmatprep.subr.bf16.mxu0 %v362_v43  ;;  %v692_v27 = vld [vmem:[%s1819_s4 + $0x38] sm:$0xff]  ;;  %v836_v29 = vld [vmem:[%s1820_s5 + $0x30] sm:$0xff]  ;;  %v1244_v30 = vld [vmem:[%s1816_s1 + $0x60] ss:$8 sps:$4 sm:$0xff]  }
  0x5e   : > { %v1245_v31 = vld [vmem:[%s1816_s1 + $0x74] ss:$8 sps:$4 sm:$0xff]   ;;  %v899_v33 = vld [vmem:[#allocation2] sm:$0x1]  ;;  %v1247_v34 = vld [vmem:[%s1816_s1 + $0x70] ss:$8 sps:$4 sm:$0xff]  }
  0x5f   : > { %438 = vperm.xlu0 %1222, %v388_v60   ;;  %v837_v32 = vld [vmem:[%s1820_s5 + $0x38] sm:$0xff]  ;;  %v1248_v35 = vld [vmem:[%s1818_s3] sm:$0xff]  }
  0x60   : > { %1053 = vmatpush3.bf16.msra.mxu0 %v354_v49  ;;  %443 = vperm.xlu1 %1223, %v389_v62  }
  0x61   : > { %1054 = vmatprep.subr.bf16.mxu0 %v363_v51  ;;  %1132 = vmatprep.mubr.bf16.mxu1 %v1248_v35 }
  0x63   : > { %448 = vperm.xlu0 %1222, %v390_v63  }
  0x64   : > { %1055 = vmatpush3.bf16.msra.mxu0 %v355_v55  ;;  %453 = vperm.xlu1 %1223, %v391_v2  }
  0x67   : > { %589 = vmatmul.mubr.bf16.vlgmr.msra.gmra.mrb[0].mxu0 %v1224_v58  ;;  %458 = vperm.xlu0 %1222, %v392_v3  }
  0x68   : > { %596 = vmatprep.mubr.bf16.mxu0 %v1227_v59  ;;  %463 = vperm.xlu1 %1223, %v393_v4  }
  0x6b   : > { %468 = vperm.xlu0 %1222, %v394_v5  }
  0x6c   : > { %473 = vperm.xlu1 %1223, %v395_v8  }
  0x6f   : > { %597 = vmatmul.mubr.bf16.gmra.mrb[4].mxu0 %v1229_v0  ;;  %695 = vperm.xlu0 %1222, %v685_v9  }
  0x70   : > { %604 = vmatprep.mubr.bf16.mxu0 %v1230_v1  ;;  %700 = vperm.xlu1 %1223, %v686_v10  }
  0x73   : > { %705 = vperm.xlu0 %1222, %v687_v11  }
  0x74   : > { %710 = vperm.xlu1 %1223, %v688_v14  }
  0x77   : > { %605 = vmatmul.mubr.bf16.gmra.mrb[8].mxu0 %v1232_v6  ;;  %840 = vperm.xlu0 %1222, %v830_v15  }
  0x78   : > { %612 = vmatprep.mubr.bf16.mxu0 %v1233_v7  ;;  %845 = vperm.xlu1 %1223, %v831_v16  }
  0x7b   : > { %715 = vperm.xlu0 %1222, %v689_v17  }
  0x7c   : > { %850 = vperm.xlu1 %1223, %v832_v20  }
  0x7f   : > { %613 = vmatmul.mubr.bf16.gmra.mrb[12].mxu0 %v1235_v12  ;;  %720 = vperm.xlu0 %1222, %v690_v21  }
  0x80   : > { %620 = vmatprep.mubr.bf16.mxu0 %v1236_v13  ;;  %855 = vperm.xlu1 %1223, %v833_v22  }
  0x83   : > { %725 = vperm.xlu0 %1222, %v691_v23  }
  0x84   : > { %860 = vperm.xlu1 %1223, %v834_v26  }
  0x87   : > { %621 = vmatmul.mubr.bf16.gmra.mrb[16].mxu0 %v1238_v18  ;;  %730 = vperm.xlu0 %1222, %v692_v27  }
  0x88   : > { %628 = vmatprep.mubr.bf16.mxu0 %v1239_v19  ;;  %865 = vperm.xlu1 %1223, %v835_v28  }
  0x8b   : > { %870 = vperm.xlu0 %1222, %v836_v29  }
  0x8c   : > { %875 = vperm.xlu1 %1223, %v837_v32  }
  0x8f   : > { %629 = vmatmul.mubr.bf16.gmra.mrb[20].mxu0 %v1241_v24  ;;  %902 = vperm.xlu0 %1222, %v899_v33  }
  0x90   : > { %636 = vmatprep.mubr.bf16.mxu0 %v1242_v25 }
  0x97   : > { %637 = vmatmul.mubr.bf16.gmra.mrb[24].mxu0 %v1244_v30 }
  0x98   : > { %644 = vmatprep.mubr.bf16.mxu0 %v1245_v31 }
  0x9f   : > { %645 = vmatmul.mubr.bf16.gmra.mrb[28].mxu0 %v1247_v34 }
  0xce   : > { %v399_v36 = vpop.permute.xlu0 %398 }
  0xcf   : > { %v409_v46 = vpop.permute.xlu1 %408 }
  0xd2   : > { %v404_v44 = vpop.permute.xlu0 %403 }
  0xd3   : > { %v414_v57 = vpop.permute.xlu1 %413 }
  0xd6   : > { %v419_v2 = vpop.permute.xlu0 %418 }
  0xd7   : > { %v424_v6 = vpop.permute.xlu1 %423 }
  0xda   : > { %v429_v15 = vpop.permute.xlu0 %428 }
  0xdb   : > { %v434_v19 = vpop.permute.xlu1 %433 }
  0xde   : > { %v439_v28 = vpop.permute.xlu0 %438 }
  0xdf   : > { %v444_v32 = vpop.permute.xlu1 %443 }
 0x13a   : > { %v1056_v37 = vpop.f32.mrb[0].mxu0 }
 0x13b   : > { %v1057_v38 = vpop.f32.mrb[1].mxu0 }
 0x13c   : > { %v1058_v39 = vadd.f32 %v1057_v38, %v1056_v37  ;;  %v1059_v40 = vpop.f32.mrb[2].mxu0 }
 0x13d   : > { %v1060_v41 = vpop.f32.mrb[3].mxu0 }
 0x13e   : > { %v591_v42 = vadd.f32 %v1058_v39, %v399_v36  ;;  %v1061_v43 = vadd.f32 %v1060_v41, %v1059_v40  ;;  %v449_v41 = vpop.permute.xlu0 %448 }
 0x140   : > { %v594_v45 = vadd.f32 %v1061_v43, %v404_v44  ;;  %v653_v47 = vmax.f32 %v591_v42, 0.0 }
 0x142   : > { %v654_v48 = vmax.f32 %v594_v45, 0.0  ;;  %v1062_v49 = vpop.f32.mrb[4].mxu0  ;;  %v454_v45 = vpop.permute.xlu1 %453 }
 0x143   : > { %v1063_v50 = vpop.f32.mrb[5].mxu0 }
 0x144   : > { %v1064_v51 = vadd.f32 %v1063_v50, %v1062_v49  ;;  %v1065_v52 = vpop.f32.mrb[6].mxu0  ;;  %v677_v53 = vpack.c.bf16 %v654_v48, %v653_v47 }
 0x145   : > { %v1066_v54 = vpop.f32.mrb[7].mxu0 }
 0x146   : > { %v599_v55 = vadd.f32 %v1064_v51, %v409_v46  ;;  %v1067_v56 = vadd.f32 %v1066_v54, %v1065_v52  ;;  %1116 = vmatprep.subr.bf16.mxu1 %v677_v53  ;;  %v459_v54 = vpop.permute.xlu0 %458 }
 0x147   : > { %1117 = vmatpush3.bf16.msra.mxu1 %v677_v53 }
 0x148   : > { %v602_v58 = vadd.f32 %v1067_v56, %v414_v57  ;;  %v655_v59 = vmax.f32 %v599_v55, 0.0 }
 0x14a   : > { %v656_v60 = vmax.f32 %v602_v58, 0.0  ;;  %v1068_v61 = vpop.f32.mrb[8].mxu0  ;;  %v464_v58 = vpop.permute.xlu1 %463 }
 0x14b   : > { %v1069_v62 = vpop.f32.mrb[9].mxu0 }
 0x14c   : > { %v1070_v63 = vadd.f32 %v1069_v62, %v1068_v61  ;;  %v1071_v0 = vpop.f32.mrb[10].mxu0  ;;  %v678_v1 = vpack.c.bf16 %v656_v60, %v655_v59 }
 0x14d   : > { %v1072_v3 = vpop.f32.mrb[11].mxu0 }
 0x14e   : > { %v607_v4 = vadd.f32 %v1070_v63, %v419_v2  ;;  %v1073_v5 = vadd.f32 %v1072_v3, %v1071_v0  ;;  %1118 = vmatprep.subr.bf16.mxu1 %v678_v1  ;;  %v469_v3 = vpop.permute.xlu0 %468 }
 0x14f   : > { %1119 = vmatpush3.bf16.msra.mxu1 %v678_v1 }
 0x150   : > { %v610_v7 = vadd.f32 %v1073_v5, %v424_v6  ;;  %v657_v8 = vmax.f32 %v607_v4, 0.0 }
 0x152   : > { %v658_v9 = vmax.f32 %v610_v7, 0.0  ;;  %v1074_v10 = vpop.f32.mrb[12].mxu0  ;;  %v474_v7 = vpop.permute.xlu1 %473 }
 0x153   : > { %v1075_v11 = vpop.f32.mrb[13].mxu0 }
 0x154   : > { %v1076_v12 = vadd.f32 %v1075_v11, %v1074_v10  ;;  %v1077_v13 = vpop.f32.mrb[14].mxu0  ;;  %v679_v14 = vpack.c.bf16 %v658_v9, %v657_v8 }
 0x155   : > { %v1078_v16 = vpop.f32.mrb[15].mxu0 }
 0x156   : > { %v615_v17 = vadd.f32 %v1076_v12, %v429_v15  ;;  %v1079_v18 = vadd.f32 %v1078_v16, %v1077_v13  ;;  %1120 = vmatprep.subr.bf16.mxu1 %v679_v14  ;;  %v1249_v12 = vld [vmem:[%s1818_s3 + $0x8] sm:$0xff]   ;;  %v1250_v13 = vld [vmem:[%s1818_s3 + $0x10] sm:$0xff]   ;;  %v696_v15 = vpop.permute.xlu0 %695  ;;  %v701_v16 = vpop.permute.xlu1 %700 }
 0x157   : > { %1121 = vmatpush3.bf16.msra.mxu1 %v679_v14  ;;  %v1251_v14 = vld [vmem:[%s1818_s3 + $0x18] sm:$0xff]  }
 0x158   : > { %v618_v20 = vadd.f32 %v1079_v18, %v434_v19  ;;  %v659_v21 = vmax.f32 %v615_v17, 0.0 }
 0x15a   : > { %v660_v22 = vmax.f32 %v618_v20, 0.0  ;;  %v1080_v23 = vpop.f32.mrb[16].mxu0  ;;  %v706_v17 = vpop.permute.xlu0 %705 }
 0x15b   : > { %v1081_v24 = vpop.f32.mrb[17].mxu0  ;;  %v711_v18 = vpop.permute.xlu1 %710 }
 0x15c   : > { %v1082_v25 = vadd.f32 %v1081_v24, %v1080_v23  ;;  %v1083_v26 = vpop.f32.mrb[18].mxu0  ;;  %v680_v27 = vpack.c.bf16 %v660_v22, %v659_v21 }
 0x15d   : > { %v1084_v29 = vpop.f32.mrb[19].mxu0 }
 0x15e   : > { %v623_v30 = vadd.f32 %v1082_v25, %v439_v28  ;;  %v1085_v31 = vadd.f32 %v1084_v29, %v1083_v26  ;;  %1122 = vmatprep.subr.bf16.mxu1 %v680_v27  ;;  %v841_v19 = vpop.permute.xlu0 %840 }
 0x15f   : > { %1123 = vmatpush3.bf16.msra.mxu1 %v680_v27  ;;  %v846_v20 = vpop.permute.xlu1 %845 }
 0x160   : > { %v626_v33 = vadd.f32 %v1085_v31, %v444_v32  ;;  %v661_v34 = vmax.f32 %v623_v30, 0.0 }
 0x162   : > { %v662_v35 = vmax.f32 %v626_v33, 0.0  ;;  %v1086_v36 = vpop.f32.mrb[20].mxu0  ;;  %v716_v21 = vpop.permute.xlu0 %715 }
 0x163   : > { %v1087_v37 = vpop.f32.mrb[21].mxu0  ;;  %v851_v22 = vpop.permute.xlu1 %850 }
 0x164   : > { %v1088_v38 = vadd.f32 %v1087_v37, %v1086_v36  ;;  %v1089_v39 = vpop.f32.mrb[22].mxu0  ;;  %v681_v40 = vpack.c.bf16 %v662_v35, %v661_v34 }
 0x165   : > { %v1090_v42 = vpop.f32.mrb[23].mxu0 }
 0x166   : > { %v631_v43 = vadd.f32 %v1088_v38, %v449_v41  ;;  %v1091_v44 = vadd.f32 %v1090_v42, %v1089_v39  ;;  %1124 = vmatprep.subr.bf16.mxu1 %v681_v40  ;;  %v721_v23 = vpop.permute.xlu0 %720 }
 0x167   : > { %1125 = vmatpush3.bf16.msra.mxu1 %v681_v40  ;;  %v856_v25 = vpop.permute.xlu1 %855 }
 0x168   : > { %v634_v46 = vadd.f32 %v1091_v44, %v454_v45  ;;  %v663_v47 = vmax.f32 %v631_v43, 0.0 }
 0x16a   : > { %v664_v48 = vmax.f32 %v634_v46, 0.0  ;;  %v1092_v49 = vpop.f32.mrb[24].mxu0  ;;  %v726_v34 = vpop.permute.xlu0 %725 }
 0x16b   : > { %v1093_v50 = vpop.f32.mrb[25].mxu0  ;;  %v861_v37 = vpop.permute.xlu1 %860 }
 0x16c   : > { %v1094_v51 = vadd.f32 %v1093_v50, %v1092_v49  ;;  %v1095_v52 = vpop.f32.mrb[26].mxu0  ;;  %v682_v53 = vpack.c.bf16 %v664_v48, %v663_v47 }
 0x16d   : > { %v1096_v55 = vpop.f32.mrb[27].mxu0 }
 0x16e   : > { %v639_v56 = vadd.f32 %v1094_v51, %v459_v54  ;;  %v1097_v57 = vadd.f32 %v1096_v55, %v1095_v52  ;;  %1126 = vmatprep.subr.bf16.mxu1 %v682_v53  ;;  %v731_v48 = vpop.permute.xlu0 %730 }
 0x16f   : > { %1127 = vmatpush3.bf16.msra.mxu1 %v682_v53  ;;  %v866_v55 = vpop.permute.xlu1 %865 }
 0x170   : > { %v642_v59 = vadd.f32 %v1097_v57, %v464_v58  ;;  %v665_v60 = vmax.f32 %v639_v56, 0.0 }
 0x172   : > { %v666_v61 = vmax.f32 %v642_v59, 0.0  ;;  %v1098_v62 = vpop.f32.mrb[28].mxu0 }
 0x173   : > { %v1099_v63 = vpop.f32.mrb[29].mxu0 }
 0x174   : > { %v1100_v0 = vadd.f32 %v1099_v63, %v1098_v62  ;;  %v1101_v1 = vpop.f32.mrb[30].mxu0  ;;  %v683_v2 = vpack.c.bf16 %v666_v61, %v665_v60  ;;  %v871_v63 = vpop.permute.xlu0 %870 }
 0x175   : > { %v1102_v4 = vpop.f32.mrb[31].mxu0 }
 0x176   : > { %v647_v5 = vadd.f32 %v1100_v0, %v469_v3  ;;  %v1103_v6 = vadd.f32 %v1102_v4, %v1101_v1  ;;  %1128 = vmatprep.subr.bf16.mxu1 %v683_v2 }
 0x177   : > { %1129 = vmatpush3.bf16.msra.mxu1 %v683_v2  ;;  %v876_v2 = vpop.permute.xlu1 %875 }
 0x178   : > { %v650_v8 = vadd.f32 %v1103_v6, %v474_v7  ;;  %v667_v9 = vmax.f32 %v647_v5, 0.0  ;;  %v905_v5 = vlaneseq }
 0x17a   : > { %v668_v10 = vmax.f32 %v650_v8, 0.0  ;;  %v906_v8 = vshrl.u32 %v905_v5, 7 }
 0x17c   : > { %v684_v11 = vpack.c.bf16 %v668_v10, %v667_v9 }
 0x17e   : > { %1130 = vmatprep.subr.bf16.mxu1 %v684_v11 }
 0x17f   : > { %1131 = vmatpush3.bf16.msra.mxu1 %v684_v11  ;;  %v907_v11 = vsub.s32 0, %v906_v8 }
 0x182   : > { %1133 = vmatmul.mubr.bf16.vlgmr.msra.gmra.mrb[0].mxu1 %v1249_v12 }
 0x183   : > { %1136 = vmatprep.mubr.bf16.mxu1 %v1250_v13  ;;  %v903_v13 = vpop.permute.xlu0 %902 }
 0x18a   : > { %1137 = vmatmul.mubr.bf16.gmra.mrb[4].mxu1 %v1251_v14 }
 0x255   : > { %v1134_v24 = vpop.f32.mrb[0].mxu1 }
 0x256   : > { %v791_v26 = vpop.f32.mrb[1].mxu1  ;;  %v800_v27 = vadd.f32 %v1134_v24, %v706_v17 }
 0x257   : > { %v792_v28 = vadd.f32 %v791_v26, %v696_v15  ;;  %v1135_v29 = vpop.f32.mrb[2].mxu1  ;;  %v908_v15 = vrot.slane %v903_v13, %v907_v11 }
 0x258   : > { %v803_v30 = vadd.f32 %v1135_v29, %v711_v18  ;;  %v794_v31 = vpop.f32.mrb[3].mxu1  ;;  %v824_v35 = vmax.f32 %v800_v27, 0.0 }
 0x259   : > { %v822_v32 = vmax.f32 %v792_v28, 0.0  ;;  %v795_v33 = vadd.f32 %v794_v31, %v701_v16 }
 0x25a   : > { %v825_v38 = vmax.f32 %v803_v30, 0.0  ;;  %v880_v43 = vmul.f32 %v851_v22, %v824_v35 }
 0x25b   : > { %v823_v36 = vmax.f32 %v795_v33, 0.0  ;;  %v878_v39 = vmul.f32 %v841_v19, %v822_v32 }
 0x25c   : > { %v881_v49 = vmul.f32 %v856_v25, %v825_v38 }
 0x25d   : > { %v879_v40 = vmul.f32 %v846_v20, %v823_v36  ;;  %v1138_v41 = vpop.f32.mrb[4].mxu1 }
 0x25e   : > { %v807_v42 = vpop.f32.mrb[5].mxu1  ;;  %v816_v45 = vadd.f32 %v1138_v41, %v726_v34 }
 0x25f   : > { %v886_v44 = vadd.f32 %v879_v40, %v878_v39  ;;  %v808_v46 = vadd.f32 %v807_v42, %v716_v21  ;;  %v1139_v47 = vpop.f32.mrb[6].mxu1 }
 0x260   : > { %v810_v50 = vpop.f32.mrb[7].mxu1  ;;  %v819_v53 = vadd.f32 %v1139_v47, %v731_v48  ;;  %v828_v56 = vmax.f32 %v816_v45, 0.0 }
 0x261   : > { %v887_v51 = vadd.f32 %v886_v44, %v880_v43  ;;  %v826_v52 = vmax.f32 %v808_v46, 0.0  ;;  %v811_v54 = vadd.f32 %v810_v50, %v721_v23 }
 0x262   : > { %v829_v61 = vmax.f32 %v819_v53, 0.0  ;;  %v884_v0 = vmul.f32 %v871_v63, %v828_v56 }
 0x263   : > { %v882_v57 = vmul.f32 %v861_v37, %v826_v52  ;;  %v888_v58 = vadd.f32 %v887_v51, %v881_v49  ;;  %v827_v59 = vmax.f32 %v811_v54, 0.0 }
 0x264   : > { %v885_v3 = vmul.f32 %v876_v2, %v829_v61 }
 0x265   : > { %v889_v60 = vadd.f32 %v888_v58, %v882_v57  ;;  %v883_v62 = vmul.f32 %v866_v55, %v827_v59 }
 0x267   : > { %v890_v1 = vadd.f32 %v889_v60, %v883_v62 }
 0x269   : > { %v891_v4 = vadd.f32 %v890_v1, %v884_v0 }
 0x26b   : > { %v892_v6 = vadd.f32 %v891_v4, %v885_v3 }
 0x26d   : > { %v893_v7 = vrot.slane %v892_v6, 4 }
 0x26f   : > { %v894_v9 = vadd.f32 %v893_v7, %v892_v6 }
 0x271   : > { %v895_v10 = vrot.slane %v894_v9, 2 }
 0x273   : > { %v896_v12 = vadd.f32 %v895_v10, %v894_v9 }
 0x275   : > { %v897_v14 = vrot.slane %v896_v12, 1 }
 0x277   : > { %v898_v16 = vadd.f32 %v897_v14, %v896_v12 }
 0x279   : > { %v909_v17 = vadd.f32 %v908_v15, %v898_v16 }
 0x27b   : > { %910 = vst [vmem:[%s314_s7] sm:$0x1] %v909_v17 }
 0x27c   : > { %1295 = shalt.err (!%p1292_p4)
}
 0x27d   : > { %s1296_s16 = scalar_lea.hbm %s1761_s15, 16  ;;  %s1300_s11 = scalar_lea.hbm %s1838_s17, 64 }
 0x27e   : > { %p1297_p3 = scmp.ne.s32.totalorder %s1761_s15, %s1296_s16  ;;  %p1301_p2 = scmp.lt.u32.totalorder %s1761_s15, %s1838_s17 }
 0x27f   : > { %p1302_p5 = scmp.lt.u32.totalorder %s1300_s11, %s1296_s16  ;;  %p1304_p8 = scmp.lt.u32.totalorder %s1296_s16, %s1761_s15 }
 0x280   : > { %p1298_p6 = pnand %p1297_p3, %p1839_p9 }
 0x281   : > { %p1303_p10 = por %p1302_p5, %p1301_p2 }
 0x282   : > { %p1299_p7 = pneg %p1298_p6 }
 0x283   : > { %p1305_p12 = por %p1304_p8, %p1303_p10 }
 0x285   : > { %p1306_p0 = pnand %p1305_p12, %p1299_p7 }
 0x287   : > { %1309 = shalt.err (!%p1306_p0)
}
 0x288   : > { %1142 = dma.vmem_to_hbm [thread:$0]  (%p1839_p9), %s1763_s13, 16, %s1761_s15, %s912_s29  }
 0x289 PF: > { %s1840_s20 = sld [smem:[#allocation9_spill]]  ;;  %p1153_p11 = scmp.ge.s32.totalorder %s1380_s6, 2 }
 0x28a   : > { %p1841_p13 = scmp.ne.s32.totalorder %s1835_s21, 0 }
 0x28c   : > { %p1149_p1 = pnand %p1153_p11, %p1841_p13 }
 0x28f   : > { %s938_s24 = sand.u32 1, %s1840_s20  }
 0x290   : > { %s939_s26 = scalar_lea.sflag [#allocation5], %s938_s24 }
 0x291   : > { %1347 = dma.done.wait (!%p1149_p1), %s939_s26, 16  }
 0x292   : > { %1349 = vsyncadd (!%p1149_p1), %s939_s26, 4294967280  ;;  %s25_s6 = sadd.s32 1, %s1380_s6   ;;  %s1842_s18 = sld [smem:[#allocation10_spill]] }
 0x293   : > { %p22_p4 = scmp.ge.s32.totalorder %s25_s6, 6   ;;  %s1843_s13 = sld [smem:[#allocation11_spill]] }
 0x294   : > { %s1844_s26 = smov %s1356_s27  ;;  %s1845_s27 = smov %s1360_s28 }
 0x295   : > { %s1846_s28 = smov %s1509_s23  ;;  %s1847_s29 = smov %s1372_s8 }
 0x296   : > { %s1848_s30 = smov %s1376_s9  ;;  %24 = sbr.rel (!%p22_p4) target bundleno = 10 (0xa), region = 93 }
 0x298   : > { %s1849_s8 = smov %s1842_s18 }
 0x299   : > { %s1850_s9 = smov %s1843_s13 }
 0x29d   :  { %943 = vsyncpa [#allocation4], 1 }
 0x29e   :  { %945 = vsyncpa [#allocation4 + $0x1], 1 }
 0x29f   :  { %946 = vsyncpa [#allocation5], 1 }
 0x2a0   :  { %948 = vsyncpa [#allocation5 + $0x1], 1 }

</bundles_post_ra>
